<compile_context>
chip_gen: v7x
topology: tpu7x:2x2x1
jax: 0.10.0
libtpu: 0.0.40
codegen_flags: <defaults>
</compile_context>

<pallas_src>
import jax
import jax.numpy as jnp
from jax.experimental import pallas as pl
from jax.experimental.pallas import tpu as pltpu


class ImageList:
    """JAX mirror of torchvision's ImageList."""

    def __init__(self, tensors, image_sizes_ori, image_sizes):
        self.tensors = tensors
        self.image_sizes_ori = image_sizes_ori
        self.image_sizes = image_sizes


def _resize_max_hw(height_ori, width_ori, max_width, max_height):
    """Mirror PreProcess.resize_max size computation exactly (Python floats + int())."""
    max_width = max_width or width_ori
    max_height = max_height or height_ori
    width = max_width
    height = width / width_ori * height_ori
    if height > max_height:
        height = max_height
        width = height / height_ori * width_ori
    return int(height), int(width)


def _bilinear_matrix(out_size, in_size):
    """Row-stochastic [out_size, in_size] matrix equal to PyTorch bilinear,
    align_corners=False (half-pixel centers, negative source clamped to 0)."""
    i = jnp.arange(out_size, dtype=jnp.float32)
    scale = in_size / out_size
    src = (i + 0.5) * scale - 0.5
    src = jnp.maximum(src, 0.0)
    i0 = jnp.minimum(jnp.floor(src).astype(jnp.int32), in_size - 1)
    i1 = jnp.minimum(i0 + 1, in_size - 1)
    lam = jnp.clip(src - i0.astype(jnp.float32), 0.0, 1.0)
    rows = jnp.arange(out_size)
    A = jnp.zeros((out_size, in_size), jnp.float32)
    A = A.at[rows, i0].add(1.0 - lam)
    A = A.at[rows, i1].add(lam)
    return A


def _round_up(v, m):
    return (v + m - 1) // m * m


def preprocess(x, target_list=None, max_size=None,
               mean=(0.485, 0.456, 0.406), std=(0.229, 0.224, 0.225)):
    """x: [N, C, H, W] float32 (batch of same-sized images, NCHW).
    Returns (ImageList, targets) matching PreProcess.forward semantics."""
    N, C, H, W = x.shape
    h_new, w_new = _resize_max_hw(H, W, max_size, max_size)
    X = max(h_new, w_new)                      # zero_padding default max_padding

    Xs = _round_up(X, 128)                     # padded square side written by the kernel
    Xc = _round_up(w_new, 128)                 # live cols actually computed on the MXU
    TX = 256 if Xs % 256 == 0 else 128         # output-row tile
    n_row_tiles = Xs // TX
    n_live_tiles = -(-h_new // TX)             # row tiles that contain any live output row

    # Bilinear weight matrices; rows >= resized size are zero -> zero padding built in.
    A_h = jnp.zeros((Xs, H), jnp.float32).at[:h_new].set(_bilinear_matrix(h_new, H))
    A_w = jnp.zeros((Xc, W), jnp.float32).at[:w_new].set(_bilinear_matrix(w_new, W))
    A_h_bf = A_h.astype(jnp.bfloat16)
    A_wT_bf = A_w.astype(jnp.bfloat16).T                             # [W, Xc]
    # Row sums of the bf16 weights (==1 valid / ==0 pad) for the folded bias.
    rh = A_h_bf.astype(jnp.float32).sum(axis=1, keepdims=True)       # [Xs, 1]
    rw = A_wT_bf.astype(jnp.float32).sum(axis=0).reshape(1, Xc)      # [1, Xc]

    std_arr = jnp.asarray(std, jnp.float32)
    scale_arr = 1.0 / std_arr                                        # (C,) 1/std
    bias_arr = jnp.asarray(mean, jnp.float32) / std_arr              # (C,) mean/std

    x_bf = x.astype(jnp.bfloat16)   # halves input DMA; raw pixels go straight to MXU

    def kernel(scale_ref, bias_ref, x_ref, ah_ref, awt_ref, rh_ref, rw_ref,
               o_ref, tmp_ref):
        """One (image, output-row-tile) grid step, all C channels.

        scale_ref/bias_ref: SMEM (C,) f32
        x_ref:   VMEM (1, C, H, W) bf16   whole image (block index constant over i)
        ah_ref:  VMEM (TX, H)      bf16   row-tile of the H bilinear matrix
        awt_ref: VMEM (W, Xc)      bf16   W bilinear matrix, transposed
        rh_ref:  VMEM (TX, 1) f32, rw_ref: VMEM (1, Xc) f32   (valid-region mask)
        o_ref:   VMEM (1, C, TX, Xs) f32
        tmp_ref: VMEM (C*TX, W) bf16 scratch (packed row-resized rows, all channels)
        """
        i = pl.program_id(1)

        @pl.when(i < n_live_tiles)
        def _live():
            mask = rh_ref[...] * rw_ref[...]                          # [TX, Xc] VPU
            # Stage 1: per-channel row resize (contract H) into packed scratch.
            for c in range(C):                                        # C small & static
                t = jnp.dot(ah_ref[...], x_ref[0, c],
                            preferred_element_type=jnp.float32)       # [TX, W]  MXU
                tmp_ref[c * TX:(c + 1) * TX, :] = t.astype(jnp.bfloat16)
            # Stage 2: one column-resize matmul for all channels at once.
            big = jnp.dot(tmp_ref[...], awt_ref[...],
                          preferred_element_type=jnp.float32)         # [C*TX, Xc] MXU
            for c in range(C):
                r = big[c * TX:(c + 1) * TX, :]
                # Post-resize normalization: (resized - mean*mask)/std; exactly 0 in pad.
                o_ref[0, c, :, :Xc] = scale_ref[c] * r - bias_ref[c] * mask
            if Xs > Xc:   # zero pad columns of the square output, in-kernel
                o_ref[0, :, :, Xc:] = jnp.zeros((C, TX, Xs - Xc), jnp.float32)

        @pl.when(i >= n_live_tiles)
        def _dead():     # row tiles fully inside the zero-pad region: pure memset
            o_ref[...] = jnp.zeros_like(o_ref)

    # VMEM budget: double-buffered blocks + scratch + matmul intermediates.
    block_bytes = (C * H * W * 2 + TX * H * 2 + W * Xc * 2
                   + (TX + Xc) * 4 + C * TX * Xs * 4)
    interm_bytes = C * TX * W * 2 + C * TX * Xc * 4 + TX * max(W, Xc) * 4
    vmem_limit = int(min(64 * 2 ** 20,
                         max(32 * 2 ** 20, 2 * block_bytes + interm_bytes)))

    flops = 2 * N * C * n_live_tiles * TX * (H * W + W * Xc)
    bytes_accessed = (N * C * H * W * 2 + N * C * Xs * Xs * 4
                      + Xs * H * 2 + W * Xc * 2)

    out_k = pl.pallas_call(
        kernel,
        out_shape=jax.ShapeDtypeStruct((N, C, Xs, Xs), jnp.float32),
        grid=(N, n_row_tiles),
        in_specs=[
            pl.BlockSpec(memory_space=pltpu.MemorySpace.SMEM),        # scale (1/std)
            pl.BlockSpec(memory_space=pltpu.MemorySpace.SMEM),        # bias (mean/std)
            pl.BlockSpec((1, C, H, W), lambda n, i: (n, 0, 0, 0)),    # x (bf16)
            pl.BlockSpec((TX, H), lambda n, i: (i, 0)),               # A_h row tile
            pl.BlockSpec((W, Xc), lambda n, i: (0, 0)),               # A_w^T
            pl.BlockSpec((TX, 1), lambda n, i: (i, 0)),               # rh tile
            pl.BlockSpec((1, Xc), lambda n, i: (0, 0)),               # rw
        ],
        out_specs=pl.BlockSpec((1, C, TX, Xs), lambda n, i: (n, 0, i, 0)),
        scratch_shapes=[pltpu.VMEM((C * TX, W), jnp.bfloat16)],
        compiler_params=pltpu.CompilerParams(
            dimension_semantics=("parallel", "parallel"),
            vmem_limit_bytes=vmem_limit),
        cost_estimate=pl.CostEstimate(flops=flops, transcendentals=0,
                                      bytes_accessed=bytes_accessed),
    )(scale_arr, bias_arr, x_bf, A_h_bf, A_wT_bf, rh, rw)

    # Kernel already produced the zero-padded square; at most a single slice remains.
    tensors = out_k if Xs == X else out_k[:, :, :X, :X]

    image_sizes_ori = [(H, W)] * N
    image_sizes = [(h_new, w_new)] * N

    targets = None
    if target_list is not None:
        # Matches: target['boxes'] = target['boxes'] * height / height_ori
        # (height is the int()-truncated resized height, as in the module).
        targets = [{"labels": t["labels"], "boxes": t["boxes"] * h_new / H}
                   for t in target_list]

    return ImageList(tensors, image_sizes_ori, image_sizes), targets


if __name__ == "__main__":
    key = jax.random.PRNGKey(0)
    N, C, H, W = 2, 3, 16, 12
    max_size = 8

    kx, kb = jax.random.split(key)
    x = jax.random.uniform(kx, (N, C, H, W), jnp.float32)
    target_list = [
        {"labels": jnp.array([1, 2], jnp.int32),
         "boxes": jax.random.uniform(kb, (2, 4), jnp.float32) * 10.0},
        {"labels": jnp.array([3], jnp.int32),
         "boxes": jnp.array([[1.0, 2.0, 5.0, 7.0]], jnp.float32)},
    ]

    image_list, targets = preprocess(x, target_list, max_size)
    out = jax.block_until_ready(image_list.tensors)

    # Independent pure-JAX reference: normalize -> jax.image.resize (bilinear,
    # half-pixel centers, antialias=False == F.interpolate(mode='bilinear',
    # align_corners=False)) -> zero pad to (X, X).
    h_new, w_new = _resize_max_hw(H, W, max_size, max_size)
    X = max(h_new, w_new)
    mean_b = jnp.asarray((0.485, 0.456, 0.406), jnp.float32).reshape(1, C, 1, 1)
    std_b = jnp.asarray((0.229, 0.224, 0.225), jnp.float32).reshape(1, C, 1, 1)
    xn = (x - mean_b) / std_b
    resized = jax.image.resize(xn, (N, C, h_new, w_new), method="bilinear",
                               antialias=False)
    ref = jnp.zeros((N, C, X, X), jnp.float32).at[:, :, :h_new, :w_new].set(resized)

    assert out.shape == (N, C, X, X), out.shape
    max_err = float(jnp.max(jnp.abs(out - ref)))
    assert max_err < 8e-2, max_err          # loose tolerance: bf16 MXU operands
    assert targets is not None and targets[0]["boxes"].shape == (2, 4)
    assert jnp.allclose(targets[0]["boxes"], target_list[0]["boxes"] * h_new / H)
    assert image_list.image_sizes == [(h_new, w_new)] * N
    assert image_list.image_sizes_ori == [(H, W)] * N

    print("KERNEL_OK")
</pallas_src>

<mosaic_0001>
module attributes {stable_mosaic.version = 11 : i64} {
  func.func @kernel(%arg0: i32, %arg1: i32, %arg2: memref<3xf32, #tpu.memory_space<smem>>, %arg3: memref<3xf32, #tpu.memory_space<smem>>, %arg4: memref<1x3x16x12xbf16, #tpu.memory_space<vmem>>, %arg5: memref<128x16xbf16, #tpu.memory_space<vmem>>, %arg6: memref<12x128xbf16, #tpu.memory_space<vmem>>, %arg7: memref<128x1xf32, #tpu.memory_space<vmem>>, %arg8: memref<1x128xf32, #tpu.memory_space<vmem>>, %arg9: memref<1x3x128x128xf32, #tpu.memory_space<vmem>>, %arg10: memref<384x12xbf16, #tpu.memory_space<vmem>>) attributes {dimension_semantics = [#tpu.dimension_semantics<parallel>, #tpu.dimension_semantics<parallel>], iteration_bounds = array<i64: 2, 1>, scalar_prefetch = 0 : i64, scratch_operands = 1 : i64, tpu.core_type = #tpu.core_type<tc>, window_params = [{transform_indices = @transform_0, window_bounds = array<i64: 3>}, {transform_indices = @transform_1, window_bounds = array<i64: 3>}, {transform_indices = @transform_2, window_bounds = array<i64: 1, 3, 16, 12>}, {transform_indices = @transform_3, window_bounds = array<i64: 128, 16>}, {pipeline_mode = #tpu.pipeline_mode<synchronous>, transform_indices = @transform_4, window_bounds = array<i64: 12, 128>}, {transform_indices = @transform_5, window_bounds = array<i64: 128, 1>}, {pipeline_mode = #tpu.pipeline_mode<synchronous>, transform_indices = @transform_6, window_bounds = array<i64: 1, 128>}, {transform_indices = @transform_7, window_bounds = array<i64: 1, 3, 128, 128>}]} {
    %c1_i32 = arith.constant 1 : i32
    %0 = arith.cmpi slt, %arg1, %c1_i32 : i32
    %1 = arith.extui %0 : i1 to i32
    %c0_i32 = arith.constant 0 : i32
    %2 = arith.cmpi ne, %1, %c0_i32 : i32
    scf.if %2 {
      %c0 = arith.constant 0 : index
      %c0_2 = arith.constant 0 : index
      %6 = vector.load %arg7[%c0, %c0_2] : memref<128x1xf32, #tpu.memory_space<vmem>>, vector<128x1xf32>
      %c0_3 = arith.constant 0 : index
      %c0_4 = arith.constant 0 : index
      %7 = vector.load %arg8[%c0_3, %c0_4] : memref<1x128xf32, #tpu.memory_space<vmem>>, vector<1x128xf32>
      %8 = vector.broadcast %6 : vector<128x1xf32> to vector<128x128xf32>
      %9 = vector.broadcast %7 : vector<1x128xf32> to vector<128x128xf32>
      %10 = arith.mulf %8, %9 : vector<128x128xf32>
      %c0_5 = arith.constant 0 : index
      %c0_6 = arith.constant 0 : index
      %11 = vector.load %arg5[%c0_5, %c0_6] : memref<128x16xbf16, #tpu.memory_space<vmem>>, vector<128x16xbf16>
      %c0_7 = arith.constant 0 : index
      %c0_8 = arith.constant 0 : index
      %c0_9 = arith.constant 0 : index
      %c0_10 = arith.constant 0 : index
      %12 = vector.load %arg4[%c0_7, %c0_8, %c0_9, %c0_10] : memref<1x3x16x12xbf16, #tpu.memory_space<vmem>>, vector<1x1x16x12xbf16>
      %13 = vector.shape_cast %12 : vector<1x1x16x12xbf16> to vector<16x12xbf16>
      %cst = arith.constant dense<0.000000e+00> : vector<128x12xf32>
      %14 = tpu.matmul %11, %13, %cst {dimension_numbers = #tpu.dot_dimension_numbers<[1], [0], [0], [1], [0, 0, 1, 1], [], []>} : vector<128x16xbf16>, vector<16x12xbf16>, vector<128x12xf32> -> vector<128x12xf32>
      %15 = arith.truncf %14 : vector<128x12xf32> to vector<128x12xbf16>
      %c0_11 = arith.constant 0 : index
      %c0_12 = arith.constant 0 : index
      %16 = vector.load %arg10[%c0_11, %c0_12] : memref<384x12xbf16, #tpu.memory_space<vmem>>, vector<128x12xbf16>
      tpu.vector_store %arg10[%c0_11, %c0_12], %15 {strides = array<i32>} : memref<384x12xbf16, #tpu.memory_space<vmem>>, vector<128x12xbf16>,
      %c0_13 = arith.constant 0 : index
      %c0_14 = arith.constant 0 : index
      %17 = vector.load %arg5[%c0_13, %c0_14] : memref<128x16xbf16, #tpu.memory_space<vmem>>, vector<128x16xbf16>
      %c0_15 = arith.constant 0 : index
      %c1 = arith.constant 1 : index
      %c0_16 = arith.constant 0 : index
      %c0_17 = arith.constant 0 : index
      %18 = vector.load %arg4[%c0_15, %c1, %c0_16, %c0_17] : memref<1x3x16x12xbf16, #tpu.memory_space<vmem>>, vector<1x1x16x12xbf16>
      %19 = vector.shape_cast %18 : vector<1x1x16x12xbf16> to vector<16x12xbf16>
      %cst_18 = arith.constant dense<0.000000e+00> : vector<128x12xf32>
      %20 = tpu.matmul %17, %19, %cst_18 {dimension_numbers = #tpu.dot_dimension_numbers<[1], [0], [0], [1], [0, 0, 1, 1], [], []>} : vector<128x16xbf16>, vector<16x12xbf16>, vector<128x12xf32> -> vector<128x12xf32>
      %21 = arith.truncf %20 : vector<128x12xf32> to vector<128x12xbf16>
      %c128 = arith.constant 128 : index
      %c0_19 = arith.constant 0 : index
      %22 = vector.load %arg10[%c128, %c0_19] : memref<384x12xbf16, #tpu.memory_space<vmem>>, vector<128x12xbf16>
      tpu.vector_store %arg10[%c128, %c0_19], %21 {strides = array<i32>} : memref<384x12xbf16, #tpu.memory_space<vmem>>, vector<128x12xbf16>,
      %c0_20 = arith.constant 0 : index
      %c0_21 = arith.constant 0 : index
      %23 = vector.load %arg5[%c0_20, %c0_21] : memref<128x16xbf16, #tpu.memory_space<vmem>>, vector<128x16xbf16>
      %c0_22 = arith.constant 0 : index
      %c2 = arith.constant 2 : index
      %c0_23 = arith.constant 0 : index
      %c0_24 = arith.constant 0 : index
      %24 = vector.load %arg4[%c0_22, %c2, %c0_23, %c0_24] : memref<1x3x16x12xbf16, #tpu.memory_space<vmem>>, vector<1x1x16x12xbf16>
      %25 = vector.shape_cast %24 : vector<1x1x16x12xbf16> to vector<16x12xbf16>
      %cst_25 = arith.constant dense<0.000000e+00> : vector<128x12xf32>
      %26 = tpu.matmul %23, %25, %cst_25 {dimension_numbers = #tpu.dot_dimension_numbers<[1], [0], [0], [1], [0, 0, 1, 1], [], []>} : vector<128x16xbf16>, vector<16x12xbf16>, vector<128x12xf32> -> vector<128x12xf32>
      %27 = arith.truncf %26 : vector<128x12xf32> to vector<128x12xbf16>
      %c256 = arith.constant 256 : index
      %c0_26 = arith.constant 0 : index
      %28 = vector.load %arg10[%c256, %c0_26] : memref<384x12xbf16, #tpu.memory_space<vmem>>, vector<128x12xbf16>
      tpu.vector_store %arg10[%c256, %c0_26], %27 {strides = array<i32>} : memref<384x12xbf16, #tpu.memory_space<vmem>>, vector<128x12xbf16>,
      %c0_27 = arith.constant 0 : index
      %c0_28 = arith.constant 0 : index
      %29 = vector.load %arg10[%c0_27, %c0_28] : memref<384x12xbf16, #tpu.memory_space<vmem>>, vector<384x12xbf16>
      %c0_29 = arith.constant 0 : index
      %c0_30 = arith.constant 0 : index
      %30 = vector.load %arg6[%c0_29, %c0_30] : memref<12x128xbf16, #tpu.memory_space<vmem>>, vector<12x128xbf16>
      %cst_31 = arith.constant dense<0.000000e+00> : vector<384x128xf32>
      %31 = tpu.matmul %29, %30, %cst_31 {dimension_numbers = #tpu.dot_dimension_numbers<[1], [0], [0], [1], [0, 0, 1, 1], [], []>} : vector<384x12xbf16>, vector<12x128xbf16>, vector<384x128xf32> -> vector<384x128xf32>
      %32 = vector.extract_strided_slice %31 {offsets = [0, 0], sizes = [128, 128], strides = [1, 1]} : vector<384x128xf32> to vector<128x128xf32>
      %c0_32 = arith.constant 0 : index
      %33 = memref.load %arg2[%c0_32] : memref<3xf32, #tpu.memory_space<smem>>
      %34 = vector.broadcast %33 : f32 to vector<128x128xf32>
      %35 = arith.mulf %34, %32 : vector<128x128xf32>
      %c0_33 = arith.constant 0 : index
      %36 = memref.load %arg3[%c0_33] : memref<3xf32, #tpu.memory_space<smem>>
      %37 = vector.broadcast %36 : f32 to vector<128x128xf32>
      %38 = arith.mulf %37, %10 : vector<128x128xf32>
      %39 = arith.subf %35, %38 : vector<128x128xf32>
      %c0_34 = arith.constant 0 : index
      %c0_35 = arith.constant 0 : index
      %c0_36 = arith.constant 0 : index
      %c0_37 = arith.constant 0 : index
      %40 = vector.load %arg9[%c0_34, %c0_35, %c0_36, %c0_37] : memref<1x3x128x128xf32, #tpu.memory_space<vmem>>, vector<1x1x128x128xf32>
      %41 = vector.shape_cast %40 : vector<1x1x128x128xf32> to vector<128x128xf32>
      %42 = vector.shape_cast %39 : vector<128x128xf32> to vector<1x1x128x128xf32>
      tpu.vector_store %arg9[%c0_34, %c0_35, %c0_36, %c0_37], %42 {strides = array<i32>} : memref<1x3x128x128xf32, #tpu.memory_space<vmem>>, vector<1x1x128x128xf32>,
      %43 = vector.extract_strided_slice %31 {offsets = [128, 0], sizes = [128, 128], strides = [1, 1]} : vector<384x128xf32> to vector<128x128xf32>
      %c1_38 = arith.constant 1 : index
      %44 = memref.load %arg2[%c1_38] : memref<3xf32, #tpu.memory_space<smem>>
      %45 = vector.broadcast %44 : f32 to vector<128x128xf32>
      %46 = arith.mulf %45, %43 : vector<128x128xf32>
      %c1_39 = arith.constant 1 : index
      %47 = memref.load %arg3[%c1_39] : memref<3xf32, #tpu.memory_space<smem>>
      %48 = vector.broadcast %47 : f32 to vector<128x128xf32>
      %49 = arith.mulf %48, %10 : vector<128x128xf32>
      %50 = arith.subf %46, %49 : vector<128x128xf32>
      %c0_40 = arith.constant 0 : index
      %c1_41 = arith.constant 1 : index
      %c0_42 = arith.constant 0 : index
      %c0_43 = arith.constant 0 : index
      %51 = vector.load %arg9[%c0_40, %c1_41, %c0_42, %c0_43] : memref<1x3x128x128xf32, #tpu.memory_space<vmem>>, vector<1x1x128x128xf32>
      %52 = vector.shape_cast %51 : vector<1x1x128x128xf32> to vector<128x128xf32>
      %53 = vector.shape_cast %50 : vector<128x128xf32> to vector<1x1x128x128xf32>
      tpu.vector_store %arg9[%c0_40, %c1_41, %c0_42, %c0_43], %53 {strides = array<i32>} : memref<1x3x128x128xf32, #tpu.memory_space<vmem>>, vector<1x1x128x128xf32>,
      %54 = vector.extract_strided_slice %31 {offsets = [256, 0], sizes = [128, 128], strides = [1, 1]} : vector<384x128xf32> to vector<128x128xf32>
      %c2_44 = arith.constant 2 : index
      %55 = memref.load %arg2[%c2_44] : memref<3xf32, #tpu.memory_space<smem>>
      %56 = vector.broadcast %55 : f32 to vector<128x128xf32>
      %57 = arith.mulf %56, %54 : vector<128x128xf32>
      %c2_45 = arith.constant 2 : index
      %58 = memref.load %arg3[%c2_45] : memref<3xf32, #tpu.memory_space<smem>>
      %59 = vector.broadcast %58 : f32 to vector<128x128xf32>
      %60 = arith.mulf %59, %10 : vector<128x128xf32>
      %61 = arith.subf %57, %60 : vector<128x128xf32>
      %c0_46 = arith.constant 0 : index
      %c2_47 = arith.constant 2 : index
      %c0_48 = arith.constant 0 : index
      %c0_49 = arith.constant 0 : index
      %62 = vector.load %arg9[%c0_46, %c2_47, %c0_48, %c0_49] : memref<1x3x128x128xf32, #tpu.memory_space<vmem>>, vector<1x1x128x128xf32>
      %63 = vector.shape_cast %62 : vector<1x1x128x128xf32> to vector<128x128xf32>
      %64 = vector.shape_cast %61 : vector<128x128xf32> to vector<1x1x128x128xf32>
      tpu.vector_store %arg9[%c0_46, %c2_47, %c0_48, %c0_49], %64 {strides = array<i32>} : memref<1x3x128x128xf32, #tpu.memory_space<vmem>>, vector<1x1x128x128xf32>,
    } else {
    }
    %c1_i32_0 = arith.constant 1 : i32
    %3 = arith.cmpi sge, %arg1, %c1_i32_0 : i32
    %4 = arith.extui %3 : i1 to i32
    %c0_i32_1 = arith.constant 0 : i32
    %5 = arith.cmpi ne, %4, %c0_i32_1 : i32
    scf.if %5 {
      %cst = arith.constant 0.000000e+00 : f32
      %6 = vector.broadcast %cst : f32 to vector<1x3x128x128xf32>
      %c0 = arith.constant 0 : index
      %c0_2 = arith.constant 0 : index
      %c0_3 = arith.constant 0 : index
      %c0_4 = arith.constant 0 : index
      %7 = vector.load %arg9[%c0, %c0_2, %c0_3, %c0_4] : memref<1x3x128x128xf32, #tpu.memory_space<vmem>>, vector<1x3x128x128xf32>
      tpu.vector_store %arg9[%c0, %c0_2, %c0_3, %c0_4], %6 {strides = array<i32>} : memref<1x3x128x128xf32, #tpu.memory_space<vmem>>, vector<1x3x128x128xf32>,
    } else {
    }
    return
  }
  func.func @transform_0(%arg0: i32, %arg1: i32) -> i32 {
    %c0_i32 = arith.constant 0 : i32
    %c0_i32_0 = arith.constant 0 : i32
    return %c0_i32 : i32
  }
  func.func @transform_1(%arg0: i32, %arg1: i32) -> i32 {
    %c0_i32 = arith.constant 0 : i32
    %c0_i32_0 = arith.constant 0 : i32
    return %c0_i32 : i32
  }
  func.func @transform_2(%arg0: i32, %arg1: i32) -> (i32, i32, i32, i32) {
    %c0_i32 = arith.constant 0 : i32
    %c0_i32_0 = arith.constant 0 : i32
    %c0_i32_1 = arith.constant 0 : i32
    %c0_i32_2 = arith.constant 0 : i32
    return %arg0, %c0_i32, %c0_i32_0, %c0_i32_1 : i32, i32, i32, i32
  }
  func.func @transform_3(%arg0: i32, %arg1: i32) -> (i32, i32) {
    %c0_i32 = arith.constant 0 : i32
    %c0_i32_0 = arith.constant 0 : i32
    return %arg1, %c0_i32 : i32, i32
  }
  func.func @transform_4(%arg0: i32, %arg1: i32) -> (i32, i32) {
    %c0_i32 = arith.constant 0 : i32
    %c0_i32_0 = arith.constant 0 : i32
    %c0_i32_1 = arith.constant 0 : i32
    return %c0_i32, %c0_i32_0 : i32, i32
  }
  func.func @transform_5(%arg0: i32, %arg1: i32) -> (i32, i32) {
    %c0_i32 = arith.constant 0 : i32
    %c0_i32_0 = arith.constant 0 : i32
    return %arg1, %c0_i32 : i32, i32
  }
  func.func @transform_6(%arg0: i32, %arg1: i32) -> (i32, i32) {
    %c0_i32 = arith.constant 0 : i32
    %c0_i32_0 = arith.constant 0 : i32
    %c0_i32_1 = arith.constant 0 : i32
    return %c0_i32, %c0_i32_0 : i32, i32
  }
  func.func @transform_7(%arg0: i32, %arg1: i32) -> (i32, i32, i32, i32) {
    %c0_i32 = arith.constant 0 : i32
    %c0_i32_0 = arith.constant 0 : i32
    %c0_i32_1 = arith.constant 0 : i32
    return %arg0, %c0_i32, %arg1, %c0_i32_0 : i32, i32, i32, i32
  }
}

</mosaic_0001>

<bundles_post_ra>
// kernel: tpu_custom_call.1
= control target key start
LH: loop header
LB: loop body
LE: loop exit
PB: predicated region body
PF: predicated region fallthrough
CT: control target
= control target key end

     0   :  { %12 = vsyncpa [#allocation5], 0  ;;  %s3002_s0 = inlined_call_operand.vmem [shape: f32[3], index: 0, kind: input, shape index: {}]   ;;  %s3003_s1 = inlined_call_operand.vmem [shape: f32[3], index: 1, kind: input, shape index: {}]   ;;  %s3004_s2 = inlined_call_operand.vmem [shape: bf16[2,3,16,12], index: 2, kind: input, shape index: {}]   ;;  %s3005_s3 = inlined_call_operand.vmem [shape: bf16[128,16], index: 3, kind: input, shape index: {}]   ;;  %s3006_s4 = inlined_call_operand.vmem [shape: bf16[12,128], index: 4, kind: input, shape index: {}]   ;;  %s3007_s5 = inlined_call_operand.vmem [shape: f32[128,1], index: 5, kind: input, shape index: {}]   ;;  %s3008_s6 = inlined_call_operand.vmem [shape: f32[1,128], index: 6, kind: input, shape index: {}]   ;;  %s3009_s7 = inlined_call_operand.hbm [shape: f32[2,3,128,128], index: 7, kind: output, shape index: {}]  }
   0x1   :  { %13 = vsyncpa [#allocation7], 0 }
   0x2   :  { %14 = vsyncpa [#allocation4], 0 }
   0x3   :  { %16 = vsyncpa [#allocation4 + $0x1], 0  ;;  %s2390_s24 = smov 0   ;;  %s2392_s25 = smov 0  }
   0x4   :  { %s2394_s26 = smov 0   ;;  %s2396_s27 = smov 0  }
   0x5   :  { %s2398_s28 = smov 0   ;;  %s2400_s29 = smov 0  }
   0x6 LB: > { %s1825_s30 = sadd.s32 4294967295, %s2342_s29   ;;  %s1826_s8 = sadd.s32 4294967294, %s2342_s29   ;;  %s2342_s29 = sphi %s2400_s29, %s22_s29   ;;  %s2338_s28 = sphi %s2398_s28, %s3027_s28   ;;  %s2334_s27 = sphi %s2396_s27, %s3026_s27   ;;  %s2330_s26 = sphi %s2394_s26, %s3025_s26   ;;  %s2326_s25 = sphi %s2392_s25, %s3024_s25   ;;  %s2322_s24 = sphi %s2390_s24, %s3023_s24  }
   0x7   : > { %s34_s9 = sadd.s32 1, %s2338_s28  ;;  %s205_s10 = sadd.s32 1, %s2330_s26 }
   0x8   : > { %p36_p0 = scmp.ge.s32.totalorder %s34_s9, 2  ;;  %p215_p1 = scmp.ne.s32.totalorder %s2330_s26, %s2326_s25 }
   0x9   : > { %p216_p2 = scmp.eq.s32.totalorder %s1825_s30, 1  ;;  %p221_p3 = scmp.ne.s32.totalorder %s2326_s25, %s2322_s24 }
   0xa   : > { %s3029_s9 = smov (%p36_p0, %s34_s9), 0  ;;  %p222_p5 = scmp.eq.s32.totalorder %s1826_s8, 1 }
   0xb   : > { %p2430_p4 = por %p216_p2, %p215_p1  ;;  %s200_s12 = ssub.s32 %s2338_s28, %s3029_s9 }
   0xc   : > { %p1827_p6 = scmp.ge.s32.totalorder %s2342_s29, 1  ;;  %p203_p7 = scmp.eq.s32.totalorder %s200_s12, 0 }
   0xd   : > { %s3014_s11 = scalar_select %p2430_p4, 1, 0 }
   0xe   : > { %p2437_p8 = por %p222_p5, %p221_p3  ;;  %p229_p9 = scmp.lt.s32.totalorder %s2342_s29, 3 }
   0xf   : > { %s2443_s14 = scalar_select %p203_p7, %s2330_s26, %s205_s10  }
  0x10   : > { %s3015_s13 = scalar_select %p2437_p8, 1, 0 }
  0x11   : > { %p2445_p10 = pnand %p1827_p6, %p229_p9  ;;  %p2449_p11 = scmp.eq.s32.totalorder %s1825_s30, 0 }
  0x12   : > { %s242_s19 = sshll.u32 %s3002_s0, 4  ;;  %s253_s22 = sshll.u32 %s3003_s1, 4  ;;  %s243_s19 = int_to_ptr.vmem [resolvable:$true] %s242_s19  ;;  %s254_s22 = int_to_ptr.vmem [resolvable:$true] %s253_s22 }
  0x13   : > { %s3016_s15 = scalar_select %p2445_p10, 1, 0 }
  0x14   : > { %s3017_s16 = scalar_select %p2449_p11, 1, 0 }
  0x15   : > { %p2127_p12 = pneg %p2445_p10  ;;  %s2226_s30 = scalar_lea.vmem %s243_s19, 16 }
  0x16   : > { %p2227_p0 = scmp.ne.s32.totalorder %s243_s19, %s2226_s30  ;;  %p2234_p5 = scmp.lt.s32.totalorder %s243_s19, %s243_s19 }
  0x17   : > { %p2463_p13 = pnand %p2449_p11, %p2127_p12  ;;  %p2235_p6 = scmp.lt.s32.totalorder %s2226_s30, %s2226_s30 }
  0x19   : > { %p2228_p1 = pneg %p2463_p13  ;;  %p2236_p7 = por %p2235_p6, %p2234_p5 }
  0x1b   : > { %p2229_p2 = pnand %p2228_p1, %p2227_p0 }
  0x1d   : > { %p2230_p3 = pneg %p2229_p2 }
  0x1f   : > { %p2237_p9 = pnand %p2236_p7, %p2230_p3 }
  0x21   : > { %2240 = shalt.err (!%p2237_p9)
}
  0x22   : > { %s2344_s8 = smov [#allocation3]   ;;  %s2241_s10 = scalar_lea.vmem %s254_s22, 16 }
  0x23   : > { %2130 = dma.vmem_to_smem (!%p2463_p13), %s243_s19, 16, %s2344_s8, [#allocation5]  }
  0x24   : > { %p2242_p12 = scmp.ne.s32.totalorder %s254_s22, %s2241_s10  ;;  %p2249_p11 = scmp.lt.s32.totalorder %s254_s22, %s254_s22 }
  0x25   : > { %p2250_p10 = scmp.lt.s32.totalorder %s2241_s10, %s2241_s10 }
  0x26   : > { %p2244_p8 = pnand %p2242_p12, %p2228_p1 }
  0x27   : > { %p2251_p0 = por %p2250_p10, %p2249_p11 }
  0x28   : > { %p2245_p4 = pneg %p2244_p8 }
  0x2a   : > { %p2252_p2 = pnand %p2251_p0, %p2245_p4 }
  0x2c   : > { %2255 = shalt.err (!%p2252_p2)
}
  0x2d   : > { %s2345_s12 = smov [#allocation6]   ;;  %p3019_p3 = scmp.ne.s32.totalorder %s3016_s15, 0 }
  0x2e   : > { %2133 = dma.vmem_to_smem (!%p2463_p13), %s254_s22, 16, %s2345_s12, [#allocation7]  }
  0x2f   : > { %298 = sbr.rel (%p3019_p3) target bundleno = 619 (0x26b), region = 48  ;;  %p3020_p5 = scmp.ne.s32.totalorder (!%p3019_p3), %s3017_s16, 0 }
  0x36   : > { %2309 = dma.done.wait (%p3020_p5), [#allocation5], 16  }
  0x37   : > { %2311 = vsyncadd (%p3020_p5), [#allocation5], 4294967280 }
  0x38   : > { %2313 = dma.done.wait (%p3020_p5), [#allocation7], 16  }
  0x39   : > { %2315 = vsyncadd (%p3020_p5), [#allocation7], 4294967280 }
  0x3a   : > { %308 = sfence }
  0x3b   : > { %p345_p4 = scmp.lt.s32.totalorder %s2334_s27, 1  ;;  %v2199_v0 = vld [vmem:[%s3005_s3] sm:$0xff]   ;;  %vm551_vm0 = vcmask 130048   ;;  %v2200_v3 = vld [vmem:[%s3005_s3 + $0x8] sm:$0xff]   ;;  %v2202_v4 = vld [vmem:[%s3005_s3 + $0x10] sm:$0xff]   ;;  %vm1197_vm1 = vcmask 1045504  }
  0x3c   : > { %2011 = vmatprep.mubr.msk.bf16.mxu0 %vm551_vm0, %v2199_v0  ;;  %v2203_v6 = vld [vmem:[%s3005_s3 + $0x18] sm:$0xff]   ;;  %v2204_v7 = vld [vmem:[%s3005_s3 + $0x20] sm:$0xff]   ;;  %v2205_v8 = vld [vmem:[%s3005_s3 + $0x28] sm:$0xff]   ;;  %v2346_v29 = vmov 0   ;;  %vm681_vm2 = vcmask 97280   ;;  %s1444_s30 = sld [smem:[#allocation6]] }
  0x3d   : > { %s346_s15 = scalar_select %p345_p4, %s2334_s27, 1  ;;  %v2206_v9 = vld [vmem:[%s3005_s3 + $0x30] sm:$0xff]   ;;  %v2207_v10 = vld [vmem:[%s3005_s3 + $0x38] sm:$0xff]   ;;  %v2208_v11 = vld [vmem:[%s3005_s3] sm:$0xff]   ;;  %2196 = vset.pattern.permute.xlu0 %v2346_v29  ;;  %2197 = vset.pattern.permute.xlu1 %v2346_v29 }
  0x3e   : > { %v2209_v12 = vld [vmem:[%s3005_s3 + $0x8] sm:$0xff]   ;;  %v2211_v13 = vld [vmem:[%s3005_s3 + $0x10] sm:$0xff]   ;;  %v2212_v14 = vld [vmem:[%s3005_s3 + $0x18] sm:$0xff]   ;;  %s1426_s8 = sld [smem:[#allocation3]]  ;;  %s342_s17 = sand.u32 1, %s2326_s25  }
  0x3f   : > { %s2115_s19 = smul.u32 24, %s346_s15  ;;  %v2213_v15 = vld [vmem:[%s3005_s3 + $0x20] sm:$0xff]   ;;  %v2214_v16 = vld [vmem:[%s3005_s3 + $0x28] sm:$0xff]   ;;  %v2215_v17 = vld [vmem:[%s3005_s3 + $0x30] sm:$0xff]   ;;  %s1918_s20 = sld [smem:[#allocation3 + $0x1]] }
  0x40   : > { %v2216_v18 = vld [vmem:[%s3005_s3 + $0x38] sm:$0xff]   ;;  %v2217_v19 = vld [vmem:[%s3005_s3] sm:$0xff]   ;;  %v2218_v20 = vld [vmem:[%s3005_s3 + $0x8] sm:$0xff]   ;;  %s2114_s18 = smul.u32 384, %s342_s17  ;;  %s1937_s21 = sld [smem:[#allocation6 + $0x2]] }
  0x41   : > { %s349_s22 = scalar_lea.vmem %s3004_s2, %s2115_s19  ;;  %v2219_v21 = vld [vmem:[%s3005_s3 + $0x10] sm:$0xff]   ;;  %v2220_v22 = vld [vmem:[%s3005_s3 + $0x18] sm:$0xff]   ;;  %v2221_v23 = vld [vmem:[%s3005_s3 + $0x20] sm:$0xff]   ;;  %s1919_s19 = sld [smem:[#allocation6 + $0x1]] }
  0x42   : > { %v2198_v1 = vld [vmem:[%s349_s22] sm:$0xff]   ;;  %v2201_v2 = vld [vmem:[%s349_s22 + $0x8] sm:$0xff]   ;;  %v2210_v5 = vld [vmem:[%s349_s22 + $0x10] sm:$0xff]   ;;  %s2725_s15 = scalar_lea.vmem [#allocation8], %s2114_s18  ;;  %s1936_s22 = sld [smem:[#allocation3 + $0x2]] }
  0x43   : > { %2009 = vmatprep.subr.bf16.mxu0 %v2198_v1  ;;  %v2222_v24 = vld [vmem:[%s3005_s3 + $0x28] sm:$0xff]   ;;  %v2223_v25 = vld [vmem:[%s3005_s3 + $0x30] sm:$0xff]   ;;  %v2224_v26 = vld [vmem:[%s3005_s3 + $0x38] sm:$0xff]   ;;  %s2116_s16 = smul.u32 6144, %s2334_s27  ;;  %s1700_s23 = sshll.u32 %s2725_s15, 4  ;;  %s2949_s23 = int_to_ptr.vmem [resolvable:$true] %s1700_s23 }
  0x44   : > { %2010 = vmatpush3.bf16.msra.mxu0 %v2198_v1  ;;  %v2225_v27 = vld [vmem:[%s3006_s4] sm:$0x3f]   ;;  %v370_v31 = vld [vmem:[%s3007_s5 + $0x10] sm:$0xff]  ;;  %v369_v32 = vld [vmem:[%s3007_s5 + $0x8] sm:$0xff]  ;;  %s2956_s10 = scalar_lea.sflag [#allocation4], %s342_s17  ;;  %s2256_s12 = scalar_lea.vmem %s2949_s23, 6144 }
  0x45   : > { %2027 = vmatprep.subr.bf16.mxu0 %v2201_v2  ;;  %2113 = vmatprep.subr.msk.bf16.mxu1 %vm1197_vm1, %v2225_v27  ;;  %v1199_v28 = vsel %vm1197_vm1, %v2225_v27, 0  ;;  %v368_v30 = vld [vmem:[%s3007_s5] sm:$0xff]  ;;  %v371_v33 = vld [vmem:[%s3007_s5 + $0x18] sm:$0xff]  ;;  %v373_v35 = vld [vmem:[%s3007_s5 + $0x28] sm:$0xff]  ;;  %p2257_p8 = scmp.ne.s32.totalorder %s2949_s23, %s2256_s12  ;;  %p3021_p10 = scmp.ne.s32.totalorder %s3014_s11, 0 }
  0x46   : > { %2064 = vmatpush3.bf16.msra.mxu1 %v1199_v28  ;;  %387 = vperm.xlu0 %2196, %v368_v30   ;;  %v372_v34 = vld [vmem:[%s3007_s5 + $0x20] sm:$0xff]  ;;  %v374_v36 = vld [vmem:[%s3007_s5 + $0x30] sm:$0xff]  ;;  %v375_v37 = vld [vmem:[%s3007_s5 + $0x38] sm:$0xff]  ;;  %s2347_s18 = smov [#allocation8]  }
  0x47   : > { %2012 = vmatmul.mubr.msk.bf16.vlgmr.msra.gmra.mrb[0].mxu0 %vm551_vm0, %v2200_v3  ;;  %397 = vperm.xlu1 %2197, %v370_v31   ;;  %v376_v38 = vld [vmem:[%s3007_s5 + $0x40] sm:$0xff]  ;;  %v377_v39 = vld [vmem:[%s3007_s5 + $0x48] sm:$0xff]  ;;  %v378_v40 = vld [vmem:[%s3007_s5 + $0x50] sm:$0xff]  ;;  %p2258_p11 = pnand %p2257_p8, %p3021_p10 }
  0x48   : > { %2028 = vmatpush3.bf16.msra.mxu0 %v2201_v2  ;;  %2015 = vmatprep.mubr.msk.bf16.mxu0 %vm551_vm0, %v2202_v4  ;;  %v379_v41 = vld [vmem:[%s3007_s5 + $0x58] sm:$0xff]  ;;  %v380_v42 = vld [vmem:[%s3007_s5 + $0x60] sm:$0xff]  ;;  %v381_v43 = vld [vmem:[%s3007_s5 + $0x68] sm:$0xff] }
  0x49   : > { %2045 = vmatprep.subr.bf16.mxu0 %v2210_v5  ;;  %v382_v44 = vld [vmem:[%s3007_s5 + $0x70] sm:$0xff]  ;;  %v383_v45 = vld [vmem:[%s3007_s5 + $0x78] sm:$0xff]  ;;  %p2259_p13 = pneg %p2258_p11 }
  0x4a   : > { %392 = vperm.xlu0 %2196, %v369_v32  }
  0x4b   : > { %402 = vperm.xlu1 %2197, %v371_v33  }
  0x4e   : > { %407 = vperm.xlu0 %2196, %v372_v34  }
  0x4f   : > { %2016 = vmatmul.mubr.msk.bf16.gmra.mrb[4].mxu0 %vm551_vm0, %v2203_v6  ;;  %412 = vperm.xlu1 %2197, %v373_v35  }
  0x50   : > { %2019 = vmatprep.mubr.msk.bf16.mxu0 %vm551_vm0, %v2204_v7 }
  0x52   : > { %417 = vperm.xlu0 %2196, %v374_v36  }
  0x53   : > { %422 = vperm.xlu1 %2197, %v375_v37  }
  0x56   : > { %427 = vperm.xlu0 %2196, %v376_v38  }
  0x57   : > { %2020 = vmatmul.mubr.msk.bf16.gmra.mrb[8].mxu0 %vm551_vm0, %v2205_v8  ;;  %432 = vperm.xlu1 %2197, %v377_v39  }
  0x58   : > { %2023 = vmatprep.mubr.msk.bf16.mxu0 %vm551_vm0, %v2206_v9 }
  0x5a   : > { %437 = vperm.xlu0 %2196, %v378_v40  }
  0x5b   : > { %442 = vperm.xlu1 %2197, %v379_v41  }
  0x5e   : > { %447 = vperm.xlu0 %2196, %v380_v42  }
  0x5f   : > { %2024 = vmatmul.mubr.msk.bf16.gmra.mrb[12].mxu0 %vm551_vm0, %v2207_v10  ;;  %452 = vperm.xlu1 %2197, %v381_v43  }
  0x60   : > { %2029 = vmatprep.mubr.msk.bf16.mxu0 %vm551_vm0, %v2208_v11 }
  0x62   : > { %457 = vperm.xlu0 %2196, %v382_v44  }
  0x63   : > { %462 = vperm.xlu1 %2197, %v383_v45  }
  0x67   : > { %2030 = vmatmul.mubr.msk.bf16.vlgmr.msra.gmra.mrb[16].mxu0 %vm551_vm0, %v2209_v12 }
  0x68   : > { %2046 = vmatpush3.bf16.msra.mxu0 %v2210_v5  ;;  %2033 = vmatprep.mubr.msk.bf16.mxu0 %vm551_vm0, %v2211_v13 }
  0x6f   : > { %2034 = vmatmul.mubr.msk.bf16.gmra.mrb[20].mxu0 %vm551_vm0, %v2212_v14 }
  0x70   : > { %2037 = vmatprep.mubr.msk.bf16.mxu0 %vm551_vm0, %v2213_v15 }
  0x77   : > { %2038 = vmatmul.mubr.msk.bf16.gmra.mrb[24].mxu0 %vm551_vm0, %v2214_v16 }
  0x78   : > { %2041 = vmatprep.mubr.msk.bf16.mxu0 %vm551_vm0, %v2215_v17 }
  0x7f   : > { %2042 = vmatmul.mubr.msk.bf16.gmra.mrb[28].mxu0 %vm551_vm0, %v2216_v18 }
  0x80   : > { %2047 = vmatprep.mubr.msk.bf16.mxu0 %vm551_vm0, %v2217_v19 }
  0x87   : > { %2048 = vmatmul.mubr.msk.bf16.vlgmr.msra.gmra.mrb[32].mxu0 %vm551_vm0, %v2218_v20 }
  0x88   : > { %2051 = vmatprep.mubr.msk.bf16.mxu0 %vm551_vm0, %v2219_v21 }
  0x8f   : > { %2052 = vmatmul.mubr.msk.bf16.gmra.mrb[36].mxu0 %vm551_vm0, %v2220_v22 }
  0x90   : > { %2055 = vmatprep.mubr.msk.bf16.mxu0 %vm551_vm0, %v2221_v23 }
  0x97   : > { %2056 = vmatmul.mubr.msk.bf16.gmra.mrb[40].mxu0 %vm551_vm0, %v2222_v24 }
  0x98   : > { %2059 = vmatprep.mubr.msk.bf16.mxu0 %vm551_vm0, %v2223_v25 }
  0x9f   : > { %2060 = vmatmul.mubr.msk.bf16.gmra.mrb[44].mxu0 %vm551_vm0, %v2224_v26 }
 0x11a   : > { %v2013_v46 = vpop.f32.mrb[0].mxu0 }
 0x11b   : > { %v610_v47 = vpop.f32.mrb[1].mxu0 }
 0x11c   : > { %v2014_v48 = vpop.f32.mrb[2].mxu0 }
 0x11d   : > { %v674_v49 = vpack.c.bf16 %v2014_v48, %v2013_v46  ;;  %v613_v50 = vpop.f32.mrb[3].mxu0 }
 0x11e   : > { %v673_v51 = vpack.c.bf16 %v613_v50, %v610_v47 }
 0x11f   : > { %683 = vst.msk [vmem:[#allocation2 + $0x8] sm:$0xff] %vm681_vm2, %v674_v49 }
 0x120   : > { %682 = vst.msk [vmem:[#allocation2] sm:$0xff] %vm681_vm2, %v673_v51 }
 0x122   : > { %v2017_v52 = vpop.f32.mrb[4].mxu0 }
 0x123   : > { %v626_v53 = vpop.f32.mrb[5].mxu0 }
 0x124   : > { %v2018_v54 = vpop.f32.mrb[6].mxu0 }
 0x125   : > { %v676_v55 = vpack.c.bf16 %v2018_v54, %v2017_v52  ;;  %v629_v56 = vpop.f32.mrb[7].mxu0 }
 0x126   : > { %v675_v57 = vpack.c.bf16 %v629_v56, %v626_v53  ;;  %v1095_v59 = vld [vmem:[#allocation2 + $0x8] sm:$0xff] }
 0x127   : > { %685 = vst.msk [vmem:[#allocation2 + $0x18] sm:$0xff] %vm681_vm2, %v676_v55  ;;  %v1094_v58 = vld [vmem:[#allocation2] sm:$0xff] }
 0x128   : > { %684 = vst.msk [vmem:[#allocation2 + $0x10] sm:$0xff] %vm681_vm2, %v675_v57  ;;  %2065 = vmatprep.mubr.msk.bf16.mxu1 %vm681_vm2, %v1094_v58 }
 0x129   : > { %2066 = vmatmul.mubr.msk.bf16.vlgmr.msra.gmra.mrb[0].mxu1 %vm681_vm2, %v1095_v59 }
 0x12a   : > { %v2021_v60 = vpop.f32.mrb[8].mxu0 }
 0x12b   : > { %v642_v61 = vpop.f32.mrb[9].mxu0 }
 0x12c   : > { %v2022_v62 = vpop.f32.mrb[10].mxu0 }
 0x12d   : > { %v678_v63 = vpack.c.bf16 %v2022_v62, %v2021_v60  ;;  %v645_v0 = vpop.f32.mrb[11].mxu0 }
 0x12e   : > { %v677_v1 = vpack.c.bf16 %v645_v0, %v642_v61  ;;  %v1097_v3 = vld [vmem:[#allocation2 + $0x18] sm:$0xff] }
 0x12f   : > { %687 = vst.msk [vmem:[#allocation2 + $0x28] sm:$0xff] %vm681_vm2, %v678_v63  ;;  %v1096_v2 = vld [vmem:[#allocation2 + $0x10] sm:$0xff] }
 0x130   : > { %686 = vst.msk [vmem:[#allocation2 + $0x20] sm:$0xff] %vm681_vm2, %v677_v1  ;;  %2069 = vmatprep.mubr.msk.bf16.mxu1 %vm681_vm2, %v1096_v2 }
 0x131   : > { %2070 = vmatmul.mubr.msk.bf16.gmra.mrb[4].mxu1 %vm681_vm2, %v1097_v3 }
 0x132   : > { %v2025_v4 = vpop.f32.mrb[12].mxu0 }
 0x133   : > { %v658_v5 = vpop.f32.mrb[13].mxu0 }
 0x134   : > { %v2026_v6 = vpop.f32.mrb[14].mxu0 }
 0x135   : > { %v680_v7 = vpack.c.bf16 %v2026_v6, %v2025_v4  ;;  %v661_v8 = vpop.f32.mrb[15].mxu0 }
 0x136   : > { %v679_v9 = vpack.c.bf16 %v661_v8, %v658_v5  ;;  %v1099_v11 = vld [vmem:[#allocation2 + $0x28] sm:$0xff] }
 0x137   : > { %689 = vst.msk [vmem:[#allocation2 + $0x38] sm:$0xff] %vm681_vm2, %v680_v7  ;;  %v1098_v10 = vld [vmem:[#allocation2 + $0x20] sm:$0xff] }
 0x138   : > { %688 = vst.msk [vmem:[#allocation2 + $0x30] sm:$0xff] %vm681_vm2, %v679_v9  ;;  %2073 = vmatprep.mubr.msk.bf16.mxu1 %vm681_vm2, %v1098_v10 }
 0x139   : > { %2074 = vmatmul.mubr.msk.bf16.gmra.mrb[8].mxu1 %vm681_vm2, %v1099_v11 }
 0x13a   : > { %v2031_v12 = vpop.f32.mrb[16].mxu0 }
 0x13b   : > { %v813_v13 = vpop.f32.mrb[17].mxu0 }
 0x13c   : > { %v2032_v14 = vpop.f32.mrb[18].mxu0 }
 0x13d   : > { %v877_v15 = vpack.c.bf16 %v2032_v14, %v2031_v12  ;;  %v816_v16 = vpop.f32.mrb[19].mxu0  ;;  %v388_v14 = vpop.permute.xlu0 %387 }
 0x13e   : > { %v876_v17 = vpack.c.bf16 %v816_v16, %v813_v13  ;;  %v1101_v19 = vld [vmem:[#allocation2 + $0x38] sm:$0xff] }
 0x13f   : > { %885 = vst.msk [vmem:[#allocation2 + $0x48] sm:$0xff] %vm681_vm2, %v877_v15  ;;  %v1100_v18 = vld [vmem:[#allocation2 + $0x30] sm:$0xff]  ;;  %v398_v15 = vpop.permute.xlu1 %397 }
 0x140   : > { %884 = vst.msk [vmem:[#allocation2 + $0x40] sm:$0xff] %vm681_vm2, %v876_v17  ;;  %2077 = vmatprep.mubr.msk.bf16.mxu1 %vm681_vm2, %v1100_v18 }
 0x141   : > { %2078 = vmatmul.mubr.msk.bf16.gmra.mrb[12].mxu1 %vm681_vm2, %v1101_v19  ;;  %v393_v16 = vpop.permute.xlu0 %392 }
 0x142   : > { %v2035_v20 = vpop.f32.mrb[20].mxu0 }
 0x143   : > { %v829_v21 = vpop.f32.mrb[21].mxu0  ;;  %v403_v17 = vpop.permute.xlu1 %402 }
 0x144   : > { %v2036_v22 = vpop.f32.mrb[22].mxu0 }
 0x145   : > { %v879_v23 = vpack.c.bf16 %v2036_v22, %v2035_v20  ;;  %v832_v24 = vpop.f32.mrb[23].mxu0  ;;  %v408_v18 = vpop.permute.xlu0 %407  ;;  %v2686_v20 = vld [vmem:[%s3008_s6] ss:$0 sm:$0xff] }
 0x146   : > { %v878_v25 = vpack.c.bf16 %v832_v24, %v829_v21  ;;  %v1103_v27 = vld [vmem:[#allocation2 + $0x48] sm:$0xff]  ;;  %v2693_v24 = vmul.f32 %v2686_v20, %v388_v14 }
 0x147   : > { %887 = vst.msk [vmem:[#allocation2 + $0x58] sm:$0xff] %vm681_vm2, %v879_v23  ;;  %v1102_v26 = vld [vmem:[#allocation2 + $0x40] sm:$0xff]  ;;  %v413_v19 = vpop.permute.xlu1 %412  ;;  %v2689_v23 = vmul.f32 %v2686_v20, %v398_v15 }
 0x148   : > { %886 = vst.msk [vmem:[#allocation2 + $0x50] sm:$0xff] %vm681_vm2, %v878_v25  ;;  %2081 = vmatprep.mubr.msk.bf16.mxu1 %vm681_vm2, %v1102_v26  ;;  %v2695_v25 = vstv %s1444_s30  ;;  %v2698_v26 = vmul.f32 %v2686_v20, %v403_v17 }
 0x149   : > { %2082 = vmatmul.mubr.msk.bf16.gmra.mrb[16].mxu1 %vm681_vm2, %v1103_v27  ;;  %v418_v21 = vpop.permute.xlu0 %417  ;;  %v2701_v27 = vmul.f32 %v2686_v20, %v393_v16 }
 0x14a   : > { %v2039_v28 = vpop.f32.mrb[24].mxu0 }
 0x14b   : > { %v845_v29 = vpop.f32.mrb[25].mxu0  ;;  %v423_v22 = vpop.permute.xlu1 %422 }
 0x14c   : > { %v2040_v30 = vpop.f32.mrb[26].mxu0 }
 0x14d   : > { %v881_v31 = vpack.c.bf16 %v2040_v30, %v2039_v28  ;;  %v848_v32 = vpop.f32.mrb[27].mxu0  ;;  %v2705_v28 = vstv %s1426_s8  ;;  %v1448_v30 = vmul.f32 %v2695_v25, %v2689_v23  ;;  %s2947_s8 = scalar_lea.hbm %s3009_s7, %s2116_s16 }
 0x14e   : > { %v880_v33 = vpack.c.bf16 %v848_v32, %v845_v29  ;;  %v1105_v35 = vld [vmem:[#allocation2 + $0x58] sm:$0xff]  ;;  %v428_v29 = vpop.permute.xlu0 %427  ;;  %v1446_v32 = vmul.f32 %v2695_v25, %v2693_v24 }
 0x14f   : > { %889 = vst.msk [vmem:[#allocation2 + $0x68] sm:$0xff] %vm681_vm2, %v881_v31  ;;  %v1104_v34 = vld [vmem:[#allocation2 + $0x50] sm:$0xff] }
 0x150   : > { %888 = vst.msk [vmem:[#allocation2 + $0x60] sm:$0xff] %vm681_vm2, %v880_v33  ;;  %2085 = vmatprep.mubr.msk.bf16.mxu1 %vm681_vm2, %v1104_v34  ;;  %v433_v33 = vpop.permute.xlu1 %432 }
 0x151   : > { %2086 = vmatmul.mubr.msk.bf16.gmra.mrb[20].mxu1 %vm681_vm2, %v1105_v35 }
 0x152   : > { %v2043_v36 = vpop.f32.mrb[28].mxu0 }
 0x153   : > { %v861_v37 = vpop.f32.mrb[29].mxu0 }
 0x154   : > { %v2044_v38 = vpop.f32.mrb[30].mxu0 }
 0x155   : > { %v883_v39 = vpack.c.bf16 %v2044_v38, %v2043_v36  ;;  %v864_v40 = vpop.f32.mrb[31].mxu0  ;;  %v1449_v36 = vmul.f32 %v2695_v25, %v2698_v26 }
 0x156   : > { %v882_v41 = vpack.c.bf16 %v864_v40, %v861_v37  ;;  %v1107_v43 = vld [vmem:[#allocation2 + $0x68] sm:$0xff] }
 0x157   : > { %891 = vst.msk [vmem:[#allocation2 + $0x78] sm:$0xff] %vm681_vm2, %v883_v39  ;;  %v1106_v42 = vld [vmem:[#allocation2 + $0x60] sm:$0xff]  ;;  %v1447_v39 = vmul.f32 %v2695_v25, %v2701_v27 }
 0x158   : > { %890 = vst.msk [vmem:[#allocation2 + $0x70] sm:$0xff] %vm681_vm2, %v882_v41  ;;  %2089 = vmatprep.mubr.msk.bf16.mxu1 %vm681_vm2, %v1106_v42 }
 0x159   : > { %2090 = vmatmul.mubr.msk.bf16.gmra.mrb[24].mxu1 %vm681_vm2, %v1107_v43  ;;  %v2719_v43 = vmul.f32 %v2686_v20, %v418_v21 }
 0x15a   : > { %v2049_v44 = vpop.f32.mrb[32].mxu0 }
 0x15b   : > { %v1015_v45 = vpop.f32.mrb[33].mxu0 }
 0x15c   : > { %v2050_v46 = vpop.f32.mrb[34].mxu0 }
 0x15d   : > { %v1079_v47 = vpack.c.bf16 %v2050_v46, %v2049_v44  ;;  %v1018_v48 = vpop.f32.mrb[35].mxu0 }
 0x15e   : > { %v1078_v49 = vpack.c.bf16 %v1018_v48, %v1015_v45  ;;  %v1109_v51 = vld [vmem:[#allocation2 + $0x78] sm:$0xff]  ;;  %v2722_v45 = vmul.f32 %v2686_v20, %v408_v18 }
 0x15f   : > { %1087 = vst.msk [vmem:[#allocation2 + $0x88] sm:$0xff] %vm681_vm2, %v1079_v47  ;;  %v1108_v50 = vld [vmem:[#allocation2 + $0x70] sm:$0xff]  ;;  %v438_v47 = vpop.permute.xlu0 %437 }
 0x160   : > { %1086 = vst.msk [vmem:[#allocation2 + $0x80] sm:$0xff] %vm681_vm2, %v1078_v49  ;;  %2093 = vmatprep.mubr.msk.bf16.mxu1 %vm681_vm2, %v1108_v50  ;;  %v2729_v49 = vmul.f32 %v2686_v20, %v423_v22 }
 0x161   : > { %2094 = vmatmul.mubr.msk.bf16.gmra.mrb[28].mxu1 %vm681_vm2, %v1109_v51  ;;  %v2733_v51 = vmul.f32 %v2686_v20, %v413_v19 }
 0x162   : > { %v2053_v52 = vpop.f32.mrb[36].mxu0 }
 0x163   : > { %v1031_v53 = vpop.f32.mrb[37].mxu0 }
 0x164   : > { %v2054_v54 = vpop.f32.mrb[38].mxu0 }
 0x165   : > { %v1081_v55 = vpack.c.bf16 %v2054_v54, %v2053_v52  ;;  %v1034_v56 = vpop.f32.mrb[39].mxu0  ;;  %v443_v52 = vpop.permute.xlu1 %442 }
 0x166   : > { %v1080_v57 = vpack.c.bf16 %v1034_v56, %v1031_v53  ;;  %v1111_v59 = vld [vmem:[#allocation2 + $0x88] sm:$0xff]  ;;  %v1452_v53 = vmul.f32 %v2695_v25, %v2719_v43 }
 0x167   : > { %1089 = vst.msk [vmem:[#allocation2 + $0x98] sm:$0xff] %vm681_vm2, %v1081_v55  ;;  %v1110_v58 = vld [vmem:[#allocation2 + $0x80] sm:$0xff]  ;;  %v1450_v55 = vmul.f32 %v2695_v25, %v2722_v45 }
 0x168   : > { %1088 = vst.msk [vmem:[#allocation2 + $0x90] sm:$0xff] %vm681_vm2, %v1080_v57  ;;  %2097 = vmatprep.mubr.msk.bf16.mxu1 %vm681_vm2, %v1110_v58  ;;  %v1453_v58 = vmul.f32 %v2695_v25, %v2729_v49 }
 0x169   : > { %2098 = vmatmul.mubr.msk.bf16.gmra.mrb[32].mxu1 %vm681_vm2, %v1111_v59 }
 0x16a   : > { %v2057_v60 = vpop.f32.mrb[40].mxu0 }
 0x16b   : > { %v1047_v61 = vpop.f32.mrb[41].mxu0 }
 0x16c   : > { %v2058_v62 = vpop.f32.mrb[42].mxu0 }
 0x16d   : > { %v1083_v63 = vpack.c.bf16 %v2058_v62, %v2057_v60  ;;  %v1050_v0 = vpop.f32.mrb[43].mxu0  ;;  %v448_v62 = vpop.permute.xlu0 %447 }
 0x16e   : > { %v1082_v1 = vpack.c.bf16 %v1050_v0, %v1047_v61  ;;  %v1113_v3 = vld [vmem:[#allocation2 + $0x98] sm:$0xff]  ;;  %v1451_v61 = vmul.f32 %v2695_v25, %v2733_v51 }
 0x16f   : > { %1091 = vst.msk [vmem:[#allocation2 + $0xa8] sm:$0xff] %vm681_vm2, %v1083_v63  ;;  %v1112_v2 = vld [vmem:[#allocation2 + $0x90] sm:$0xff] }
 0x170   : > { %1090 = vst.msk [vmem:[#allocation2 + $0xa0] sm:$0xff] %vm681_vm2, %v1082_v1  ;;  %2101 = vmatprep.mubr.msk.bf16.mxu1 %vm681_vm2, %v1112_v2  ;;  %v2749_v2 = vmul.f32 %v2686_v20, %v438_v47 }
 0x171   : > { %2102 = vmatmul.mubr.msk.bf16.gmra.mrb[36].mxu1 %vm681_vm2, %v1113_v3  ;;  %v458_v14 = vpop.permute.xlu0 %457 }
 0x172   : > { %v2061_v4 = vpop.f32.mrb[44].mxu0 }
 0x173   : > { %v1063_v5 = vpop.f32.mrb[45].mxu0 }
 0x174   : > { %v2062_v6 = vpop.f32.mrb[46].mxu0 }
 0x175   : > { %v1085_v7 = vpack.c.bf16 %v2062_v6, %v2061_v4  ;;  %v1066_v8 = vpop.f32.mrb[47].mxu0  ;;  %v2752_v4 = vmul.f32 %v2686_v20, %v428_v29  ;;  %v453_v6 = vpop.permute.xlu1 %452 }
 0x176   : > { %v1084_v9 = vpack.c.bf16 %v1066_v8, %v1063_v5  ;;  %v1115_v11 = vld [vmem:[#allocation2 + $0xa8] sm:$0xff]  ;;  %v2757_v8 = vmul.f32 %v2686_v20, %v443_v52 }
 0x177   : > { %1093 = vst.msk [vmem:[#allocation2 + $0xb8] sm:$0xff] %vm681_vm2, %v1085_v7  ;;  %v1114_v10 = vld [vmem:[#allocation2 + $0xa0] sm:$0xff] }
 0x178   : > { %1092 = vst.msk [vmem:[#allocation2 + $0xb0] sm:$0xff] %vm681_vm2, %v1084_v9  ;;  %2105 = vmatprep.mubr.msk.bf16.mxu1 %vm681_vm2, %v1114_v10  ;;  %v2761_v10 = vmul.f32 %v2686_v20, %v433_v33  ;;  %v1457_v17 = vmul.f32 %v2695_v25, %v2757_v8 }
 0x179   : > { %2106 = vmatmul.mubr.msk.bf16.gmra.mrb[40].mxu1 %vm681_vm2, %v1115_v11  ;;  %v1456_v11 = vmul.f32 %v2695_v25, %v2749_v2  ;;  %v463_v22 = vpop.permute.xlu1 %462 }
 0x17a   : > { %v1455_v21 = vmul.f32 %v2695_v25, %v2761_v10 }
 0x17e   : > { %v1117_v13 = vld [vmem:[#allocation2 + $0xb8] sm:$0xff] }
 0x17f   : > { %v1116_v12 = vld [vmem:[#allocation2 + $0xb0] sm:$0xff] }
 0x180   : > { %2109 = vmatprep.mubr.msk.bf16.mxu1 %vm681_vm2, %v1116_v12 }
 0x181   : > { %2110 = vmatmul.mubr.msk.bf16.gmra.mrb[44].mxu1 %vm681_vm2, %v1117_v13  ;;  %v1454_v13 = vmul.f32 %v2695_v25, %v2752_v4 }
 0x1fc   : > { %v2067_v31 = vpop.f32.mrb[0].mxu1 }
 0x1fd   : > { %v1430_v34 = vmul.f32 %v2067_v31, %v2705_v28  ;;  %v1235_v35 = vpop.f32.mrb[1].mxu1 }
 0x1fe   : > { %v1428_v37 = vmul.f32 %v2705_v28, %v1235_v35  ;;  %v2068_v38 = vpop.f32.mrb[2].mxu1 }
 0x1ff   : > { %v1464_v40 = vsub.f32 %v1430_v34, %v1448_v30  ;;  %v1431_v41 = vmul.f32 %v2068_v38, %v2705_v28  ;;  %v1238_v42 = vpop.f32.mrb[3].mxu1  ;;  %v2780_v34 = vmul.f32 %v2686_v20, %v448_v62 }
 0x200   : > { %v1462_v44 = vsub.f32 %v1428_v37, %v1446_v32  ;;  %v1429_v46 = vmul.f32 %v2705_v28, %v1238_v42  ;;  %v2777_v32 = vmul.f32 %v2686_v20, %v458_v14  ;;  %v2785_v37 = vmul.f32 %v2686_v20, %v463_v22 }
 0x201   : > { %1480 = vst [vmem:[%s2725_s15 + $0x10] sm:$0xff] %v1464_v40  ;;  %v1465_v48 = vsub.f32 %v1431_v41, %v1449_v36  ;;  %v1458_v42 = vmul.f32 %v2695_v25, %v2780_v34 }
 0x202   : > { %1478 = vst [vmem:[%s2725_s15] sm:$0xff] %v1462_v44  ;;  %v1463_v50 = vsub.f32 %v1429_v46, %v1447_v39  ;;  %v2789_v39 = vmul.f32 %v2686_v20, %v453_v6  ;;  %v1460_v40 = vmul.f32 %v2695_v25, %v2777_v32  ;;  %v1461_v20 = vmul.f32 %v2695_v25, %v2785_v37 }
 0x203   : > { %1481 = vst [vmem:[%s2725_s15 + $0x18] sm:$0xff] %v1465_v48 }
 0x204   : > { %1479 = vst [vmem:[%s2725_s15 + $0x8] sm:$0xff] %v1463_v50  ;;  %v2071_v54 = vpop.f32.mrb[4].mxu1  ;;  %v1459_v50 = vmul.f32 %v2695_v25, %v2789_v39 }
 0x205   : > { %v1434_v56 = vmul.f32 %v2071_v54, %v2705_v28  ;;  %v1251_v57 = vpop.f32.mrb[5].mxu1 }
 0x206   : > { %v1432_v59 = vmul.f32 %v2705_v28, %v1251_v57  ;;  %v2072_v60 = vpop.f32.mrb[6].mxu1  ;;  %v2805_v57 = vstv %s1919_s19  ;;  %s2260_s19 = sshll.u32 %s2347_s18, 4  ;;  %s2261_s19 = int_to_ptr.vmem [resolvable:$false] %s2260_s19 }
 0x207   : > { %v1468_v63 = vsub.f32 %v1434_v56, %v1452_v53  ;;  %v1435_v0 = vmul.f32 %v2072_v60, %v2705_v28  ;;  %v1254_v1 = vpop.f32.mrb[7].mxu1  ;;  %v2809_v60 = vstv %s1918_s20  ;;  %v1516_v25 = vmul.f32 %v2805_v57, %v2689_v23  ;;  %s2262_s20 = scalar_lea.vmem %s2261_s19, 12288  ;;  %p2263_p1 = scmp.lt.s32.totalorder %s2949_s23, %s2261_s19 }
 0x208   : > { %v1466_v3 = vsub.f32 %v1432_v59, %v1450_v55  ;;  %v1433_v5 = vmul.f32 %v2705_v28, %v1254_v1  ;;  %v1514_v62 = vmul.f32 %v2805_v57, %v2693_v24  ;;  %p2264_p6 = scmp.lt.s32.totalorder %s2262_s20, %s2256_s12 }
 0x209   : > { %1484 = vst [vmem:[%s2725_s15 + $0x30] sm:$0xff] %v1468_v63  ;;  %v1469_v7 = vsub.f32 %v1435_v0, %v1453_v58  ;;  %v1517_v0 = vmul.f32 %v2805_v57, %v2698_v26 }
 0x20a   : > { %1482 = vst [vmem:[%s2725_s15 + $0x20] sm:$0xff] %v1466_v3  ;;  %v1467_v9 = vsub.f32 %v1433_v5, %v1451_v61  ;;  %v1515_v5 = vmul.f32 %v2805_v57, %v2701_v27  ;;  %p2265_p7 = por %p2264_p6, %p2263_p1 }
 0x20b   : > { %1485 = vst [vmem:[%s2725_s15 + $0x38] sm:$0xff] %v1469_v7 }
 0x20c   : > { %1483 = vst [vmem:[%s2725_s15 + $0x28] sm:$0xff] %v1467_v9  ;;  %v2075_v12 = vpop.f32.mrb[8].mxu1  ;;  %p2266_p9 = pnand %p2265_p7, %p2259_p13 }
 0x20d   : > { %v1438_v15 = vmul.f32 %v2075_v12, %v2705_v28  ;;  %v1267_v16 = vpop.f32.mrb[9].mxu1 }
 0x20e   : > { %v1436_v18 = vmul.f32 %v2705_v28, %v1267_v16  ;;  %v2076_v19 = vpop.f32.mrb[10].mxu1 }
 0x20f   : > { %v1472_v29 = vsub.f32 %v1438_v15, %v1456_v11  ;;  %v1439_v30 = vmul.f32 %v2076_v19, %v2705_v28  ;;  %v1270_v31 = vpop.f32.mrb[11].mxu1  ;;  %v1520_v15 = vmul.f32 %v2805_v57, %v2719_v43 }
 0x210   : > { %v1470_v33 = vsub.f32 %v1436_v18, %v1454_v13  ;;  %v1437_v35 = vmul.f32 %v2705_v28, %v1270_v31 }
 0x211   : > { %1488 = vst [vmem:[%s2725_s15 + $0x50] sm:$0xff] %v1472_v29  ;;  %v1473_v36 = vsub.f32 %v1439_v30, %v1457_v17  ;;  %v1518_v17 = vmul.f32 %v2805_v57, %v2722_v45  ;;  %v1519_v30 = vmul.f32 %v2805_v57, %v2733_v51 }
 0x212   : > { %1486 = vst [vmem:[%s2725_s15 + $0x40] sm:$0xff] %v1470_v33  ;;  %v1471_v38 = vsub.f32 %v1437_v35, %v1455_v21  ;;  %v1521_v21 = vmul.f32 %v2805_v57, %v2729_v49 }
 0x213   : > { %1489 = vst [vmem:[%s2725_s15 + $0x58] sm:$0xff] %v1473_v36 }
 0x214   : > { %1487 = vst [vmem:[%s2725_s15 + $0x48] sm:$0xff] %v1471_v38  ;;  %v2079_v41 = vpop.f32.mrb[12].mxu1 }
 0x215   : > { %v1442_v44 = vmul.f32 %v2079_v41, %v2705_v28  ;;  %v1283_v46 = vpop.f32.mrb[13].mxu1 }
 0x216   : > { %v1440_v47 = vmul.f32 %v2705_v28, %v1283_v46  ;;  %v2080_v48 = vpop.f32.mrb[14].mxu1  ;;  %v1522_v46 = vmul.f32 %v2805_v57, %v2752_v4 }
 0x217   : > { %v1476_v52 = vsub.f32 %v1442_v44, %v1460_v40  ;;  %v1443_v53 = vmul.f32 %v2080_v48, %v2705_v28  ;;  %v1286_v54 = vpop.f32.mrb[15].mxu1  ;;  %v1525_v48 = vmul.f32 %v2805_v57, %v2757_v8 }
 0x218   : > { %v1474_v55 = vsub.f32 %v1440_v47, %v1458_v42  ;;  %v1441_v56 = vmul.f32 %v2705_v28, %v1286_v54  ;;  %v1524_v42 = vmul.f32 %v2805_v57, %v2749_v2 }
 0x219   : > { %1492 = vst [vmem:[%s2725_s15 + $0x70] sm:$0xff] %v1476_v52  ;;  %v1477_v58 = vsub.f32 %v1443_v53, %v1461_v20  ;;  %v1523_v53 = vmul.f32 %v2805_v57, %v2761_v10 }
 0x21a   : > { %1490 = vst [vmem:[%s2725_s15 + $0x60] sm:$0xff] %v1474_v55  ;;  %v1475_v59 = vsub.f32 %v1441_v56, %v1459_v50 }
 0x21b   : > { %1493 = vst [vmem:[%s2725_s15 + $0x78] sm:$0xff] %v1477_v58 }
 0x21c   : > { %1491 = vst [vmem:[%s2725_s15 + $0x68] sm:$0xff] %v1475_v59  ;;  %v2083_v61 = vpop.f32.mrb[16].mxu1 }
 0x21d   : > { %v1498_v28 = vmul.f32 %v2083_v61, %v2809_v60  ;;  %v1299_v63 = vpop.f32.mrb[17].mxu1 }
 0x21e   : > { %v1496_v1 = vmul.f32 %v2809_v60, %v1299_v63  ;;  %v2084_v3 = vpop.f32.mrb[18].mxu1  ;;  %v1526_v63 = vmul.f32 %v2805_v57, %v2780_v34 }
 0x21f   : > { %v1532_v6 = vsub.f32 %v1498_v28, %v1516_v25  ;;  %v1499_v7 = vmul.f32 %v2084_v3, %v2809_v60  ;;  %v1302_v9 = vpop.f32.mrb[19].mxu1  ;;  %v1529_v3 = vmul.f32 %v2805_v57, %v2785_v37 }
 0x220   : > { %v1530_v11 = vsub.f32 %v1496_v1, %v1514_v62  ;;  %v1497_v12 = vmul.f32 %v2809_v60, %v1302_v9  ;;  %v1528_v62 = vmul.f32 %v2805_v57, %v2777_v32 }
 0x221   : > { %1922 = vst [vmem:[%s2725_s15 + $0x90] sm:$0xff] %v1532_v6  ;;  %v1533_v13 = vsub.f32 %v1499_v7, %v1517_v0  ;;  %v1527_v7 = vmul.f32 %v2805_v57, %v2789_v39 }
 0x222   : > { %1920 = vst [vmem:[%s2725_s15 + $0x80] sm:$0xff] %v1530_v11  ;;  %v1531_v14 = vsub.f32 %v1497_v12, %v1515_v5 }
 0x223   : > { %1923 = vst [vmem:[%s2725_s15 + $0x98] sm:$0xff] %v1533_v13 }
 0x224   : > { %1921 = vst [vmem:[%s2725_s15 + $0x88] sm:$0xff] %v1531_v14  ;;  %v2087_v16 = vpop.f32.mrb[20].mxu1 }
 0x225   : > { %v1502_v18 = vmul.f32 %v2087_v16, %v2809_v60  ;;  %v1315_v19 = vpop.f32.mrb[21].mxu1 }
 0x226   : > { %v1500_v22 = vmul.f32 %v2809_v60, %v1315_v19  ;;  %v2088_v29 = vpop.f32.mrb[22].mxu1 }
 0x227   : > { %v1536_v31 = vsub.f32 %v1502_v18, %v1520_v15  ;;  %v1503_v33 = vmul.f32 %v2088_v29, %v2809_v60  ;;  %v1318_v35 = vpop.f32.mrb[23].mxu1  ;;  %v2873_v15 = vstv %s1937_s21  ;;  %v2877_v18 = vstv %s1936_s22 }
 0x228   : > { %v1534_v36 = vsub.f32 %v1500_v22, %v1518_v17  ;;  %v1501_v38 = vmul.f32 %v2809_v60, %v1318_v35  ;;  %v1585_v57 = vmul.f32 %v2873_v15, %v2689_v23  ;;  %v1583_v29 = vmul.f32 %v2873_v15, %v2693_v24 }
 0x229   : > { %1926 = vst [vmem:[%s2725_s15 + $0xb0] sm:$0xff] %v1536_v31  ;;  %v1537_v40 = vsub.f32 %v1503_v33, %v1521_v21  ;;  %v1586_v23 = vmul.f32 %v2873_v15, %v2698_v26  ;;  %v1589_v26 = vmul.f32 %v2873_v15, %v2719_v43  ;;  %v1588_v43 = vmul.f32 %v2873_v15, %v2733_v51 }
 0x22a   : > { %1924 = vst [vmem:[%s2725_s15 + $0xa0] sm:$0xff] %v1534_v36  ;;  %v1535_v41 = vsub.f32 %v1501_v38, %v1519_v30  ;;  %v1591_v51 = vmul.f32 %v2873_v15, %v2752_v4 }
 0x22b   : > { %1927 = vst [vmem:[%s2725_s15 + $0xb8] sm:$0xff] %v1537_v40  ;;  %v1584_v40 = vmul.f32 %v2873_v15, %v2701_v27  ;;  %v1587_v27 = vmul.f32 %v2873_v15, %v2722_v45 }
 0x22c   : > { %1925 = vst [vmem:[%s2725_s15 + $0xa8] sm:$0xff] %v1535_v41  ;;  %v2091_v44 = vpop.f32.mrb[24].mxu1 }
 0x22d   : > { %v1506_v20 = vmul.f32 %v2091_v44, %v2809_v60  ;;  %v1331_v47 = vpop.f32.mrb[25].mxu1 }
 0x22e   : > { %v1504_v50 = vmul.f32 %v2809_v60, %v1331_v47  ;;  %v2092_v52 = vpop.f32.mrb[26].mxu1 }
 0x22f   : > { %v1540_v54 = vsub.f32 %v1506_v20, %v1524_v42  ;;  %v1507_v55 = vmul.f32 %v2092_v52, %v2809_v60  ;;  %v1334_v56 = vpop.f32.mrb[27].mxu1  ;;  %v1590_v52 = vmul.f32 %v2873_v15, %v2729_v49  ;;  %v1593_v49 = vmul.f32 %v2873_v15, %v2749_v2 }
 0x230   : > { %v1538_v58 = vsub.f32 %v1504_v50, %v1522_v46  ;;  %v1505_v59 = vmul.f32 %v2809_v60, %v1334_v56 }
 0x231   : > { %1930 = vst [vmem:[%s2725_s15 + $0xd0] sm:$0xff] %v1540_v54  ;;  %v1541_v25 = vsub.f32 %v1507_v55, %v1525_v48 }
 0x232   : > { %1928 = vst [vmem:[%s2725_s15 + $0xc0] sm:$0xff] %v1538_v58  ;;  %v1539_v61 = vsub.f32 %v1505_v59, %v1523_v53 }
 0x233   : > { %1931 = vst [vmem:[%s2725_s15 + $0xd8] sm:$0xff] %v1541_v25 }
 0x234   : > { %1929 = vst [vmem:[%s2725_s15 + $0xc8] sm:$0xff] %v1539_v61  ;;  %v2095_v28 = vpop.f32.mrb[28].mxu1 }
 0x235   : > { %v1510_v0 = vmul.f32 %v2095_v28, %v2809_v60  ;;  %v1347_v1 = vpop.f32.mrb[29].mxu1 }
 0x236   : > { %v1508_v5 = vmul.f32 %v2809_v60, %v1347_v1  ;;  %v2096_v6 = vpop.f32.mrb[30].mxu1 }
 0x237   : > { %v1544_v9 = vsub.f32 %v1510_v0, %v1528_v62  ;;  %v1511_v11 = vmul.f32 %v2096_v6, %v2809_v60  ;;  %v1350_v12 = vpop.f32.mrb[31].mxu1  ;;  %v1594_v0 = vmul.f32 %v2873_v15, %v2757_v8  ;;  %v1597_v8 = vmul.f32 %v2873_v15, %v2777_v32 }
 0x238   : > { %v1542_v13 = vsub.f32 %v1508_v5, %v1526_v63  ;;  %v1509_v14 = vmul.f32 %v2809_v60, %v1350_v12  ;;  %v1592_v5 = vmul.f32 %v2873_v15, %v2761_v10  ;;  %v1595_v10 = vmul.f32 %v2873_v15, %v2780_v34 }
 0x239   : > { %1934 = vst [vmem:[%s2725_s15 + $0xf0] sm:$0xff] %v1544_v9  ;;  %v1545_v16 = vsub.f32 %v1511_v11, %v1529_v3 }
 0x23a   : > { %1932 = vst [vmem:[%s2725_s15 + $0xe0] sm:$0xff] %v1542_v13  ;;  %v1543_v17 = vsub.f32 %v1509_v14, %v1527_v7 }
 0x23b   : > { %1935 = vst [vmem:[%s2725_s15 + $0xf8] sm:$0xff] %v1545_v16 }
 0x23c   : > { %1933 = vst [vmem:[%s2725_s15 + $0xe8] sm:$0xff] %v1543_v17  ;;  %v2099_v19 = vpop.f32.mrb[32].mxu1  ;;  %v1598_v17 = vmul.f32 %v2873_v15, %v2785_v37 }
 0x23d   : > { %v1567_v21 = vmul.f32 %v2099_v19, %v2877_v18  ;;  %v1363_v60 = vpop.f32.mrb[33].mxu1 }
 0x23e   : > { %v1565_v22 = vmul.f32 %v2877_v18, %v1363_v60  ;;  %v2100_v30 = vpop.f32.mrb[34].mxu1 }
 0x23f   : > { %v1601_v31 = vsub.f32 %v1567_v21, %v1585_v57  ;;  %v1568_v33 = vmul.f32 %v2100_v30, %v2877_v18  ;;  %v1366_v35 = vpop.f32.mrb[35].mxu1  ;;  %v1596_v21 = vmul.f32 %v2873_v15, %v2789_v39 }
 0x240   : > { %v1599_v36 = vsub.f32 %v1565_v22, %v1583_v29  ;;  %v1566_v38 = vmul.f32 %v2877_v18, %v1366_v35 }
 0x241   : > { %1940 = vst [vmem:[%s2725_s15 + $0x110] sm:$0xff] %v1601_v31  ;;  %v1602_v41 = vsub.f32 %v1568_v33, %v1586_v23 }
 0x242   : > { %1938 = vst [vmem:[%s2725_s15 + $0x100] sm:$0xff] %v1599_v36  ;;  %v1600_v42 = vsub.f32 %v1566_v38, %v1584_v40 }
 0x243   : > { %1941 = vst [vmem:[%s2725_s15 + $0x118] sm:$0xff] %v1602_v41 }
 0x244   : > { %1939 = vst [vmem:[%s2725_s15 + $0x108] sm:$0xff] %v1600_v42  ;;  %v2103_v24 = vpop.f32.mrb[36].mxu1 }
 0x245   : > { %v1571_v44 = vmul.f32 %v2103_v24, %v2877_v18  ;;  %v1379_v46 = vpop.f32.mrb[37].mxu1 }
 0x246   : > { %v1569_v20 = vmul.f32 %v2877_v18, %v1379_v46  ;;  %v2104_v47 = vpop.f32.mrb[38].mxu1 }
 0x247   : > { %v1605_v48 = vsub.f32 %v1571_v44, %v1589_v26  ;;  %v1572_v50 = vmul.f32 %v2104_v47, %v2877_v18  ;;  %v1382_v53 = vpop.f32.mrb[39].mxu1 }
 0x248   : > { %v1603_v54 = vsub.f32 %v1569_v20, %v1587_v27  ;;  %v1570_v55 = vmul.f32 %v2877_v18, %v1382_v53 }
 0x249   : > { %1944 = vst [vmem:[%s2725_s15 + $0x130] sm:$0xff] %v1605_v48  ;;  %v1606_v56 = vsub.f32 %v1572_v50, %v1590_v52 }
 0x24a   : > { %1942 = vst [vmem:[%s2725_s15 + $0x120] sm:$0xff] %v1603_v54  ;;  %v1604_v58 = vsub.f32 %v1570_v55, %v1588_v43 }
 0x24b   : > { %1945 = vst [vmem:[%s2725_s15 + $0x138] sm:$0xff] %v1606_v56 }
 0x24c   : > { %1943 = vst [vmem:[%s2725_s15 + $0x128] sm:$0xff] %v1604_v58  ;;  %v2107_v45 = vpop.f32.mrb[40].mxu1 }
 0x24d   : > { %v1575_v59 = vmul.f32 %v2107_v45, %v2877_v18  ;;  %v1395_v25 = vpop.f32.mrb[41].mxu1 }
 0x24e   : > { %v1573_v61 = vmul.f32 %v2877_v18, %v1395_v25  ;;  %v2108_v62 = vpop.f32.mrb[42].mxu1 }
 0x24f   : > { %v1609_v28 = vsub.f32 %v1575_v59, %v1593_v49  ;;  %v1576_v63 = vmul.f32 %v2108_v62, %v2877_v18  ;;  %v1398_v1 = vpop.f32.mrb[43].mxu1 }
 0x250   : > { %v1607_v3 = vsub.f32 %v1573_v61, %v1591_v51  ;;  %v1574_v2 = vmul.f32 %v2877_v18, %v1398_v1 }
 0x251   : > { %1948 = vst [vmem:[%s2725_s15 + $0x150] sm:$0xff] %v1609_v28  ;;  %v1610_v6 = vsub.f32 %v1576_v63, %v1594_v0 }
 0x252   : > { %1946 = vst [vmem:[%s2725_s15 + $0x140] sm:$0xff] %v1607_v3  ;;  %v1608_v4 = vsub.f32 %v1574_v2, %v1592_v5 }
 0x253   : > { %1949 = vst [vmem:[%s2725_s15 + $0x158] sm:$0xff] %v1610_v6 }
 0x254   : > { %1947 = vst [vmem:[%s2725_s15 + $0x148] sm:$0xff] %v1608_v4  ;;  %v2111_v7 = vpop.f32.mrb[44].mxu1 }
 0x255   : > { %v1579_v9 = vmul.f32 %v2111_v7, %v2877_v18  ;;  %v1411_v11 = vpop.f32.mrb[45].mxu1 }
 0x256   : > { %v1577_v12 = vmul.f32 %v2877_v18, %v1411_v11  ;;  %v2112_v13 = vpop.f32.mrb[46].mxu1 }
 0x257   : > { %v1613_v14 = vsub.f32 %v1579_v9, %v1597_v8  ;;  %v1580_v16 = vmul.f32 %v2112_v13, %v2877_v18  ;;  %v1414_v32 = vpop.f32.mrb[47].mxu1 }
 0x258   : > { %v1611_v57 = vsub.f32 %v1577_v12, %v1595_v10  ;;  %v1578_v19 = vmul.f32 %v2877_v18, %v1414_v32 }
 0x259   : > { %1952 = vst [vmem:[%s2725_s15 + $0x170] sm:$0xff] %v1613_v14  ;;  %v1614_v34 = vsub.f32 %v1580_v16, %v1598_v17 }
 0x25a   : > { %1950 = vst [vmem:[%s2725_s15 + $0x160] sm:$0xff] %v1611_v57  ;;  %v1612_v37 = vsub.f32 %v1578_v19, %v1596_v21 }
 0x25b   : > { %1953 = vst [vmem:[%s2725_s15 + $0x178] sm:$0xff] %v1614_v34 }
 0x25c   : > { %1951 = vst [vmem:[%s2725_s15 + $0x168] sm:$0xff] %v1612_v37 }
 0x25d   : > { %2269 = shalt.err (!%p2266_p9)
}
 0x25e   : > { %s2270_s17 = scalar_lea.hbm %s2947_s8, 6144  ;;  %s2274_s22 = scalar_lea.hbm %s3009_s7, 12288 }
 0x25f   : > { %p2271_p12 = scmp.ne.s32.totalorder %s2947_s8, %s2270_s17  ;;  %p2275_p3 = scmp.lt.u32.totalorder %s2947_s8, %s3009_s7 }
 0x260   : > { %p2276_p5 = scmp.lt.u32.totalorder %s2274_s22, %s2270_s17  ;;  %p2278_p8 = scmp.lt.u32.totalorder %s2270_s17, %s2947_s8 }
 0x261   : > { %p2272_p0 = pnand %p2271_p12, %p3021_p10 }
 0x262   : > { %p2277_p4 = por %p2276_p5, %p2275_p3 }
 0x263   : > { %p2273_p2 = pneg %p2272_p0 }
 0x264   : > { %p2279_p11 = por %p2278_p8, %p2277_p4 }
 0x266   : > { %p2280_p13 = pnand %p2279_p11, %p2273_p2 }
 0x268   : > { %2283 = shalt.err (!%p2280_p13)
}
 0x269   : > { %s2348_s30 = smov 128   ;;  %s2349_s12 = smov 8  }
 0x26a   : > { %2125 = dma.vmem_to_hbm [thread:$0]  (%p3021_p10), %s2949_s23, 6144, %s2947_s8, %s2956_s10, %s2348_s30, %s2348_s30, %s2349_s12  }
 0x26b PF: > { %p2142_p1 = scmp.ge.s32.totalorder %s2342_s29, 2  ;;  %s1715_s18 = sand.u32 1, %s2322_s24  }
 0x26c   : > { %p3022_p6 = scmp.ne.s32.totalorder %s3015_s13, 0  ;;  %s1716_s19 = scalar_lea.sflag [#allocation4], %s1715_s18 }
 0x26e   : > { %p2135_p7 = pnand %p2142_p1, %p3022_p6 }
 0x270   : > { %2317 = dma.done.wait (!%p2135_p7), %s1716_s19, 6144  }
 0x271   : > { %2319 = vsyncadd (!%p2135_p7), %s1716_s19, 4294961152  ;;  %s22_s29 = sadd.s32 1, %s2342_s29   ;;  %s3023_s24 = smov %s2326_s25 }
 0x272   : > { %p19_p9 = scmp.ge.s32.totalorder %s22_s29, 4   ;;  %s3024_s25 = smov %s2330_s26 }
 0x273   : > { %s3025_s26 = smov %s2443_s14  ;;  %s3026_s27 = smov %s2338_s28 }
 0x274   : > { %s3027_s28 = smov %s3029_s9  ;;  %21 = sbr.rel (!%p19_p9) target bundleno = 6 (0x6), region = 110 }
 0x27b   :  { %1721 = vsyncpa [#allocation4], 1 }
 0x27c   :  { %1723 = vsyncpa [#allocation4 + $0x1], 1 }
 0x27d   :  { %1724 = vsyncpa [#allocation5], 1 }
 0x27e   :  { %1726 = vsyncpa [#allocation5 + $0x1], 1 }
 0x27f   :  { %1727 = vsyncpa [#allocation7], 1 }

</bundles_post_ra>
